<compile_context>
chip_gen: v5e
topology: v5e:2x2
jax: 0.10.0
libtpu: 0.0.40
codegen_flags: <defaults>
</compile_context>

<pallas_src>
import math
import functools

import jax
import jax.numpy as jnp
from jax.experimental import pallas as pl
from jax.experimental.pallas import tpu as pltpu


def _round_up(x, m):
    return ((x + m - 1) // m) * m


def _global_linear_kernel(node_seg_ref, edge_seg_ref,
                          node_feat_ref, edge_feat_ref, glob_feat_ref,
                          w_fused_ref, bias_ref,
                          out_ref,
                          agg_ref,
                          *, fn_pad, fe_pad, fg_pad):
    k = pl.program_id(0)
    g_pad = out_ref.shape[0]
    tile_n = node_seg_ref.shape[1]
    tile_e = edge_seg_ref.shape[1]

    # ---- init fused accumulator: [zeros(node) | zeros(edge) | globals] ----
    @pl.when(k == 0)
    def _init():
        agg_ref[...] = jnp.zeros_like(agg_ref)
        agg_ref[:, fn_pad + fe_pad:fn_pad + fe_pad + fg_pad] = glob_feat_ref[...]

    # ---- one-hot segment masks (reuse iota when tiles share a shape) ----
    gid_n = jax.lax.broadcasted_iota(jnp.int32, (g_pad, tile_n), 0)
    gid_e = gid_n if tile_e == tile_n else jax.lax.broadcasted_iota(
        jnp.int32, (g_pad, tile_e), 0)

    mask_n = (node_seg_ref[...] == gid_n).astype(jnp.float32)   # [G_pad, tile_n]
    mask_e = (edge_seg_ref[...] == gid_e).astype(jnp.float32)   # [G_pad, tile_e]

    # ---- per-tile segment-sum on the MXU, accumulated in aligned slices ----
    agg_ref[:, 0:fn_pad] += jnp.dot(
        mask_n, node_feat_ref[...], preferred_element_type=jnp.float32)
    agg_ref[:, fn_pad:fn_pad + fe_pad] += jnp.dot(
        mask_e, edge_feat_ref[...], preferred_element_type=jnp.float32)

    # ---- epilogue: one fused lane-dense projection + bias ----
    @pl.when(k == pl.num_programs(0) - 1)
    def _finalize():
        out_ref[...] = (
            jnp.dot(agg_ref[...], w_fused_ref[...],
                    preferred_element_type=jnp.float32)
            + bias_ref[...]
        ).astype(out_ref.dtype)


def global_linear(node_features, edge_features, global_features,
                  node_seg_ids, edge_seg_ids,
                  w_node, w_edge, w_global, bias,
                  *, tile_rows=512):
    """Pallas-backed GlobalLinear forward. Returns new global_features [G, out]."""
    N, Fn = node_features.shape
    E, Fe = edge_features.shape
    G, Fg = global_features.shape
    OUT = w_node.shape[0]
    f32 = jnp.float32

    # Sublane / lane friendly padding (pure wrapper-side plumbing).
    G_pad = _round_up(G, 8)
    OUT_pad = _round_up(OUT, 128)
    Fn_pad = _round_up(Fn, 128)
    Fe_pad = _round_up(Fe, 128)
    Fg_pad = _round_up(Fg, 128)
    F_tot = Fn_pad + Fe_pad + Fg_pad

    # Row tiling: both branches share one reduction grid axis; pad rows so
    # every grid step has a full (zero / seg-id=-1) tile.
    tile_n = min(tile_rows, _round_up(max(N, 1), 128))
    tile_e = min(tile_rows, _round_up(max(E, 1), 128))
    num_k = max(pl.cdiv(max(N, 1), tile_n), pl.cdiv(max(E, 1), tile_e), 1)
    N_pad = num_k * tile_n
    E_pad = num_k * tile_e

    node_p = jnp.zeros((N_pad, Fn_pad), f32).at[:N, :Fn].set(node_features.astype(f32))
    edge_p = jnp.zeros((E_pad, Fe_pad), f32).at[:E, :Fe].set(edge_features.astype(f32))
    glob_p = jnp.zeros((G_pad, Fg_pad), f32).at[:G, :Fg].set(global_features.astype(f32))

    # Padded rows get segment id -1 -> never match any graph id.
    nseg_p = jnp.full((1, N_pad), -1, jnp.int32).at[0, :N].set(
        node_seg_ids.reshape(-1).astype(jnp.int32))
    eseg_p = jnp.full((1, E_pad), -1, jnp.int32).at[0, :E].set(
        edge_seg_ids.reshape(-1).astype(jnp.int32))

    # Fused, pre-transposed weight: [F_tot, OUT_pad]; pieces at 128-aligned rows.
    w_fused = jnp.zeros((F_tot, OUT_pad), f32)
    w_fused = w_fused.at[0:Fn, 0:OUT].set(w_node.T.astype(f32))
    w_fused = w_fused.at[Fn_pad:Fn_pad + Fe, 0:OUT].set(w_edge.T.astype(f32))
    w_fused = w_fused.at[Fn_pad + Fe_pad:Fn_pad + Fe_pad + Fg, 0:OUT].set(
        w_global.T.astype(f32))

    bias_p = jnp.zeros((1, OUT_pad), f32).at[0, :OUT].set(bias.astype(f32))

    kernel = pl.pallas_call(
        functools.partial(_global_linear_kernel,
                          fn_pad=Fn_pad, fe_pad=Fe_pad, fg_pad=Fg_pad),
        out_shape=jax.ShapeDtypeStruct((G_pad, OUT_pad), f32),
        grid_spec=pltpu.PrefetchScalarGridSpec(
            num_scalar_prefetch=0,
            grid=(num_k,),
            in_specs=[
                pl.BlockSpec((1, tile_n), lambda k: (0, k)),        # node seg ids
                pl.BlockSpec((1, tile_e), lambda k: (0, k)),        # edge seg ids
                pl.BlockSpec((tile_n, Fn_pad), lambda k: (k, 0)),   # node features
                pl.BlockSpec((tile_e, Fe_pad), lambda k: (k, 0)),   # edge features
                pl.BlockSpec((G_pad, Fg_pad), lambda k: (0, 0)),    # global features
                pl.BlockSpec((F_tot, OUT_pad), lambda k: (0, 0)),   # fused weights
                pl.BlockSpec((1, OUT_pad), lambda k: (0, 0)),       # bias
            ],
            out_specs=pl.BlockSpec((G_pad, OUT_pad), lambda k: (0, 0)),
            scratch_shapes=[pltpu.VMEM((G_pad, F_tot), f32)],
        ),
        compiler_params=pltpu.CompilerParams(
            dimension_semantics=("arbitrary",)),
    )
    out_padded = kernel(nseg_p, eseg_p, node_p, edge_p, glob_p, w_fused, bias_p)
    return out_padded[:G, :OUT]


def _kaiming_uniform(key, out_f, in_f):
    # matches nn.init.kaiming_uniform_(param, a=sqrt(5)) for a 2-D [out, in] weight:
    # bound = sqrt(6 / ((1 + a^2) * fan_in)) = 1 / sqrt(fan_in)
    bound = 1.0 / math.sqrt(in_f)
    return jax.random.uniform(key, (out_f, in_f), jnp.float32, -bound, bound)


if __name__ == "__main__":
    key = jax.random.PRNGKey(0)
    ks = jax.random.split(key, 8)

    # Small synthetic graph batch.
    num_nodes_by_graph = [3, 5, 2, 4]     # G = 4 graphs, N = 14 nodes
    num_edges_by_graph = [4, 2, 6, 3]     # E = 15 edges
    G = len(num_nodes_by_graph)
    N = sum(num_nodes_by_graph)
    E = sum(num_edges_by_graph)
    F_node, F_edge, F_glob, OUT = 8, 6, 5, 16

    node_features = jax.random.normal(ks[0], (N, F_node), jnp.float32)
    edge_features = jax.random.normal(ks[1], (E, F_edge), jnp.float32)
    global_features = jax.random.normal(ks[2], (G, F_glob), jnp.float32)

    # segment_lengths_to_ids equivalent
    node_seg = jnp.repeat(jnp.arange(G, dtype=jnp.int32),
                          jnp.array(num_nodes_by_graph)).reshape(1, N)
    edge_seg = jnp.repeat(jnp.arange(G, dtype=jnp.int32),
                          jnp.array(num_edges_by_graph)).reshape(1, E)

    # Deterministic parameter init matching _reset_parameters.
    w_node = _kaiming_uniform(ks[3], OUT, F_node)
    w_edge = _kaiming_uniform(ks[4], OUT, F_edge)
    w_glob = _kaiming_uniform(ks[5], OUT, F_glob)
    b_bound = 1.0 / math.sqrt(OUT)
    bias = jax.random.uniform(ks[6], (OUT,), jnp.float32, -b_bound, b_bound)

    out = global_linear(node_features, edge_features, global_features,
                        node_seg, edge_seg, w_node, w_edge, w_glob, bias)
    out = jax.block_until_ready(out)

    # Pure-JAX reference (aggregation = sum).
    agg_n = jax.ops.segment_sum(node_features, node_seg[0], num_segments=G)
    agg_e = jax.ops.segment_sum(edge_features, edge_seg[0], num_segments=G)
    ref = agg_n @ w_node.T + agg_e @ w_edge.T + global_features @ w_glob.T + bias

    assert out.shape == (G, OUT)
    assert jnp.allclose(out, ref, atol=1e-5, rtol=1e-5), "mismatch vs reference"
    print("KERNEL_OK")
</pallas_src>

<mosaic_0001>
module attributes {stable_mosaic.version = 11 : i64} {
  func.func @_global_linear_kernel(%arg0: i32, %arg1: memref<1x128xi32, #tpu.memory_space<vmem>>, %arg2: memref<1x128xi32, #tpu.memory_space<vmem>>, %arg3: memref<128x128xf32, #tpu.memory_space<vmem>>, %arg4: memref<128x128xf32, #tpu.memory_space<vmem>>, %arg5: memref<8x128xf32, #tpu.memory_space<vmem>>, %arg6: memref<384x128xf32, #tpu.memory_space<vmem>>, %arg7: memref<1x128xf32, #tpu.memory_space<vmem>>, %arg8: memref<8x128xf32, #tpu.memory_space<vmem>>, %arg9: memref<8x384xf32, #tpu.memory_space<vmem>>) attributes {dimension_semantics = [#tpu.dimension_semantics<arbitrary>], iteration_bounds = array<i64: 1>, scalar_prefetch = 0 : i64, scratch_operands = 1 : i64, tpu.core_type = #tpu.core_type<tc>, window_params = [{transform_indices = @transform_0, window_bounds = array<i64: 1, 128>}, {transform_indices = @transform_1, window_bounds = array<i64: 1, 128>}, {transform_indices = @transform_2, window_bounds = array<i64: 128, 128>}, {transform_indices = @transform_3, window_bounds = array<i64: 128, 128>}, {pipeline_mode = #tpu.pipeline_mode<synchronous>, transform_indices = @transform_4, window_bounds = array<i64: 8, 128>}, {pipeline_mode = #tpu.pipeline_mode<synchronous>, transform_indices = @transform_5, window_bounds = array<i64: 384, 128>}, {pipeline_mode = #tpu.pipeline_mode<synchronous>, transform_indices = @transform_6, window_bounds = array<i64: 1, 128>}, {pipeline_mode = #tpu.pipeline_mode<synchronous>, transform_indices = @transform_7, window_bounds = array<i64: 8, 128>}]} {
    %c0_i32 = arith.constant 0 : i32
    %0 = arith.cmpi eq, %arg0, %c0_i32 : i32
    %1 = arith.extui %0 : i1 to i32
    %c0_i32_0 = arith.constant 0 : i32
    %2 = arith.cmpi ne, %1, %c0_i32_0 : i32
    scf.if %2 {
      %cst_18 = arith.constant 0.000000e+00 : f32
      %27 = vector.broadcast %cst_18 : f32 to vector<8x384xf32>
      %c0_19 = arith.constant 0 : index
      %c0_20 = arith.constant 0 : index
      %28 = vector.load %arg9[%c0_19, %c0_20] : memref<8x384xf32, #tpu.memory_space<vmem>>, vector<8x384xf32>
      tpu.vector_store %arg9[%c0_19, %c0_20], %27 {strides = array<i32>} : memref<8x384xf32, #tpu.memory_space<vmem>>, vector<8x384xf32>,
      %c0_21 = arith.constant 0 : index
      %c0_22 = arith.constant 0 : index
      %29 = vector.load %arg5[%c0_21, %c0_22] : memref<8x128xf32, #tpu.memory_space<vmem>>, vector<8x128xf32>
      %c0_23 = arith.constant 0 : index
      %c256 = arith.constant 256 : index
      %30 = vector.load %arg9[%c0_23, %c256] : memref<8x384xf32, #tpu.memory_space<vmem>>, vector<8x128xf32>
      tpu.vector_store %arg9[%c0_23, %c256], %29 {strides = array<i32>} : memref<8x384xf32, #tpu.memory_space<vmem>>, vector<8x128xf32>,
    } else {
    }
    %3 = tpu.iota {dimensions = array<i32: 0>} : vector<8x128xi32>
    %c0 = arith.constant 0 : index
    %c0_1 = arith.constant 0 : index
    %4 = vector.load %arg1[%c0, %c0_1] : memref<1x128xi32, #tpu.memory_space<vmem>>, vector<1x128xi32>
    %5 = vector.broadcast %4 : vector<1x128xi32> to vector<8x128xi32>
    %6 = arith.cmpi eq, %5, %3 : vector<8x128xi32>
    %7 = arith.extui %6 : vector<8x128xi1> to vector<8x128xi32>
    %8 = arith.sitofp %7 : vector<8x128xi32> to vector<8x128xf32>
    %c0_2 = arith.constant 0 : index
    %c0_3 = arith.constant 0 : index
    %9 = vector.load %arg2[%c0_2, %c0_3] : memref<1x128xi32, #tpu.memory_space<vmem>>, vector<1x128xi32>
    %10 = vector.broadcast %9 : vector<1x128xi32> to vector<8x128xi32>
    %11 = arith.cmpi eq, %10, %3 : vector<8x128xi32>
    %12 = arith.extui %11 : vector<8x128xi1> to vector<8x128xi32>
    %13 = arith.sitofp %12 : vector<8x128xi32> to vector<8x128xf32>
    %c0_4 = arith.constant 0 : index
    %c0_5 = arith.constant 0 : index
    %14 = vector.load %arg9[%c0_4, %c0_5] : memref<8x384xf32, #tpu.memory_space<vmem>>, vector<8x128xf32>
    %c0_6 = arith.constant 0 : index
    %c0_7 = arith.constant 0 : index
    %15 = vector.load %arg3[%c0_6, %c0_7] : memref<128x128xf32, #tpu.memory_space<vmem>>, vector<128x128xf32>
    %cst = arith.constant dense<0.000000e+00> : vector<8x128xf32>
    %16 = tpu.matmul %8, %15, %cst {dimension_numbers = #tpu.dot_dimension_numbers<[1], [0], [0], [1], [0, 0, 1, 1], [], []>} : vector<8x128xf32>, vector<128x128xf32>, vector<8x128xf32> -> vector<8x128xf32>
    %17 = arith.addf %14, %16 : vector<8x128xf32>
    %c0_8 = arith.constant 0 : index
    %c0_9 = arith.constant 0 : index
    %18 = vector.load %arg9[%c0_8, %c0_9] : memref<8x384xf32, #tpu.memory_space<vmem>>, vector<8x128xf32>
    tpu.vector_store %arg9[%c0_8, %c0_9], %17 {strides = array<i32>} : memref<8x384xf32, #tpu.memory_space<vmem>>, vector<8x128xf32>,
    %c0_10 = arith.constant 0 : index
    %c128 = arith.constant 128 : index
    %19 = vector.load %arg9[%c0_10, %c128] : memref<8x384xf32, #tpu.memory_space<vmem>>, vector<8x128xf32>
    %c0_11 = arith.constant 0 : index
    %c0_12 = arith.constant 0 : index
    %20 = vector.load %arg4[%c0_11, %c0_12] : memref<128x128xf32, #tpu.memory_space<vmem>>, vector<128x128xf32>
    %cst_13 = arith.constant dense<0.000000e+00> : vector<8x128xf32>
    %21 = tpu.matmul %13, %20, %cst_13 {dimension_numbers = #tpu.dot_dimension_numbers<[1], [0], [0], [1], [0, 0, 1, 1], [], []>} : vector<8x128xf32>, vector<128x128xf32>, vector<8x128xf32> -> vector<8x128xf32>
    %22 = arith.addf %19, %21 : vector<8x128xf32>
    %c0_14 = arith.constant 0 : index
    %c128_15 = arith.constant 128 : index
    %23 = vector.load %arg9[%c0_14, %c128_15] : memref<8x384xf32, #tpu.memory_space<vmem>>, vector<8x128xf32>
    tpu.vector_store %arg9[%c0_14, %c128_15], %22 {strides = array<i32>} : memref<8x384xf32, #tpu.memory_space<vmem>>, vector<8x128xf32>,
    %c0_i32_16 = arith.constant 0 : i32
    %24 = arith.cmpi eq, %arg0, %c0_i32_16 : i32
    %25 = arith.extui %24 : i1 to i32
    %c0_i32_17 = arith.constant 0 : i32
    %26 = arith.cmpi ne, %25, %c0_i32_17 : i32
    scf.if %26 {
      %c0_18 = arith.constant 0 : index
      %c0_19 = arith.constant 0 : index
      %27 = vector.load %arg9[%c0_18, %c0_19] : memref<8x384xf32, #tpu.memory_space<vmem>>, vector<8x384xf32>
      %c0_20 = arith.constant 0 : index
      %c0_21 = arith.constant 0 : index
      %28 = vector.load %arg6[%c0_20, %c0_21] : memref<384x128xf32, #tpu.memory_space<vmem>>, vector<384x128xf32>
      %cst_22 = arith.constant dense<0.000000e+00> : vector<8x128xf32>
      %29 = tpu.matmul %27, %28, %cst_22 {dimension_numbers = #tpu.dot_dimension_numbers<[1], [0], [0], [1], [0, 0, 1, 1], [], []>} : vector<8x384xf32>, vector<384x128xf32>, vector<8x128xf32> -> vector<8x128xf32>
      %c0_23 = arith.constant 0 : index
      %c0_24 = arith.constant 0 : index
      %30 = vector.load %arg7[%c0_23, %c0_24] : memref<1x128xf32, #tpu.memory_space<vmem>>, vector<1x128xf32>
      %31 = vector.broadcast %30 : vector<1x128xf32> to vector<8x128xf32>
      %32 = arith.addf %29, %31 : vector<8x128xf32>
      %c0_25 = arith.constant 0 : index
      %c0_26 = arith.constant 0 : index
      %33 = vector.load %arg8[%c0_25, %c0_26] : memref<8x128xf32, #tpu.memory_space<vmem>>, vector<8x128xf32>
      tpu.vector_store %arg8[%c0_25, %c0_26], %32 {strides = array<i32>} : memref<8x128xf32, #tpu.memory_space<vmem>>, vector<8x128xf32>,
    } else {
    }
    return
  }
  func.func @transform_0(%arg0: i32) -> (i32, i32) {
    %c0_i32 = arith.constant 0 : i32
    %c0_i32_0 = arith.constant 0 : i32
    return %c0_i32, %arg0 : i32, i32
  }
  func.func @transform_1(%arg0: i32) -> (i32, i32) {
    %c0_i32 = arith.constant 0 : i32
    %c0_i32_0 = arith.constant 0 : i32
    return %c0_i32, %arg0 : i32, i32
  }
  func.func @transform_2(%arg0: i32) -> (i32, i32) {
    %c0_i32 = arith.constant 0 : i32
    %c0_i32_0 = arith.constant 0 : i32
    return %arg0, %c0_i32 : i32, i32
  }
  func.func @transform_3(%arg0: i32) -> (i32, i32) {
    %c0_i32 = arith.constant 0 : i32
    %c0_i32_0 = arith.constant 0 : i32
    return %arg0, %c0_i32 : i32, i32
  }
  func.func @transform_4(%arg0: i32) -> (i32, i32) {
    %c0_i32 = arith.constant 0 : i32
    %c0_i32_0 = arith.constant 0 : i32
    %c0_i32_1 = arith.constant 0 : i32
    return %c0_i32, %c0_i32_0 : i32, i32
  }
  func.func @transform_5(%arg0: i32) -> (i32, i32) {
    %c0_i32 = arith.constant 0 : i32
    %c0_i32_0 = arith.constant 0 : i32
    %c0_i32_1 = arith.constant 0 : i32
    return %c0_i32, %c0_i32_0 : i32, i32
  }
  func.func @transform_6(%arg0: i32) -> (i32, i32) {
    %c0_i32 = arith.constant 0 : i32
    %c0_i32_0 = arith.constant 0 : i32
    %c0_i32_1 = arith.constant 0 : i32
    return %c0_i32, %c0_i32_0 : i32, i32
  }
  func.func @transform_7(%arg0: i32) -> (i32, i32) {
    %c0_i32 = arith.constant 0 : i32
    %c0_i32_0 = arith.constant 0 : i32
    %c0_i32_1 = arith.constant 0 : i32
    return %c0_i32, %c0_i32_0 : i32, i32
  }
}

</mosaic_0001>

<bundles_post_ra>
// kernel: tpu_custom_call.1
= control target key start
LH: loop header
LB: loop body
LE: loop exit
PB: predicated region body
PF: predicated region fallthrough
CT: control target
= control target key end

     0   :  { %12 = vsyncpa [#allocation4], 0  ;;  %s622_s0 = inlined_call_operand.hbm [shape: s32[1,128], index: 0, kind: input, shape index: {}]   ;;  %s623_s1 = inlined_call_operand.hbm [shape: s32[1,128], index: 1, kind: input, shape index: {}]   ;;  %s624_s2 = inlined_call_operand.hbm [shape: f32[128,128], index: 2, kind: input, shape index: {}]   ;;  %s625_s3 = inlined_call_operand.hbm [shape: f32[128,128], index: 3, kind: input, shape index: {}]   ;;  %s626_s4 = inlined_call_operand.hbm [shape: f32[8,128], index: 4, kind: input, shape index: {}]   ;;  %s627_s5 = inlined_call_operand.hbm [shape: f32[384,128], index: 5, kind: input, shape index: {}]   ;;  %s628_s6 = inlined_call_operand.vmem [shape: f32[1,128], index: 6, kind: input, shape index: {}]   ;;  %s629_s7 = inlined_call_operand.hbm [shape: f32[8,128], index: 7, kind: output, shape index: {}]  }
   0x1   :  { %13 = vsyncpa [#allocation7], 0 }
   0x2   :  { %14 = vsyncpa [#allocation10], 0 }
   0x3   :  { %15 = vsyncpa [#allocation13], 0  ;;  %s33_s26 = sshll.u32 %s623_s1, 4  ;;  %s34_s26 = int_to_ptr.hbm [resolvable:$true] %s33_s26 }
   0x4   :  { %16 = vsyncpa [#allocation5], 0  ;;  %s548_s27 = smov [#allocation6]   ;;  %s56_s8 = sshll.u32 %s625_s3, 4  ;;  %s57_s8 = int_to_ptr.hbm [resolvable:$true] %s56_s8 }
   0x5   :  { %s35_s28 = sshll.u32 %s548_s27, 4  ;;  %s549_s9 = smov [#allocation9]   ;;  %s36_s28 = int_to_ptr.vmem [resolvable:$true] %s35_s28 }
   0x6   :  { %38 = dma.hbm_to_vmem [thread:$0]  %s34_s26, 16, %s36_s28, [#allocation7]  }
   0x7   :  { %s58_s10 = sshll.u32 %s549_s9, 4  ;;  %s22_s13 = sshll.u32 %s622_s0, 4  ;;  %s59_s10 = int_to_ptr.vmem [resolvable:$true] %s58_s10  ;;  %s23_s13 = int_to_ptr.hbm [resolvable:$true] %s22_s13 }
   0x8   :  { %s550_s1 = smov 128   ;;  %s551_s14 = smov 8  }
   0x9   :  { %64 = dma.hbm_to_vmem [thread:$0]  %s57_s8, 2048, %s59_s10, [#allocation10], %s550_s1, %s550_s1, %s551_s14  }
   0xa   :  { %s43_s17 = sshll.u32 %s624_s2, 4  ;;  %s552_s18 = smov [#allocation3]   ;;  %s44_s17 = int_to_ptr.hbm [resolvable:$true] %s43_s17 }
   0xb   :  { %s24_s19 = sshll.u32 %s552_s18, 4  ;;  %s553_s3 = smov [#allocation8]   ;;  %s25_s19 = int_to_ptr.vmem [resolvable:$true] %s24_s19 }
   0xc   :  { %27 = dma.hbm_to_vmem [thread:$0]  %s23_s13, 16, %s25_s19, [#allocation4]  }
   0xd   :  { %s45_s20 = sshll.u32 %s553_s3, 4  ;;  %s70_s0 = sshll.u32 %s626_s4, 4  ;;  %s46_s20 = int_to_ptr.vmem [resolvable:$true] %s45_s20  ;;  %s71_s0 = int_to_ptr.hbm [resolvable:$true] %s70_s0 }
   0xe   :  { %51 = dma.hbm_to_vmem [thread:$0]  %s44_s17, 2048, %s46_s20, [#allocation7], %s550_s1, %s550_s1, %s551_s14  }
   0xf   :  { %s80_s25 = sshll.u32 %s627_s5, 4  ;;  %s554_s26 = smov [#allocation11]   ;;  %s81_s25 = int_to_ptr.hbm [resolvable:$true] %s80_s25 }
  0x10   :  { %s72_s2 = sshll.u32 %s554_s26, 4  ;;  %s555_s27 = smov [#allocation12]   ;;  %s73_s2 = int_to_ptr.vmem [resolvable:$true] %s72_s2 }
  0x11   :  { %75 = dma.hbm_to_vmem [thread:$0]  %s71_s0, 128, %s73_s2, [#allocation10]  }
  0x12   :  { %s82_s28 = sshll.u32 %s555_s27, 4  ;;  %s83_s28 = int_to_ptr.vmem [resolvable:$true] %s82_s28 }
  0x13   :  { %88 = dma.hbm_to_vmem [thread:$0]  %s81_s25, 6144, %s83_s28, [#allocation13], %s550_s1, %s550_s1, %s551_s14  }
  0x14   :  { %538 = dma.done.wait [#allocation4], 16  }
  0x15   :  { %539 = vsyncadd [#allocation4], 4294967280 }
  0x16   :  { %540 = dma.done.wait [#allocation7], 2064  }
  0x17   :  { %541 = vsyncadd [#allocation7], 4294965232 }
  0x18   :  { %542 = dma.done.wait [#allocation10], 2176  }
  0x19   :  { %543 = vsyncadd [#allocation10], 4294965120 }
  0x1a   :  { %544 = dma.done.wait [#allocation13], 6144  }
  0x1b   :  { %545 = vsyncadd [#allocation13], 4294961152  ;;  %v152_v0 = vld [vmem:[#allocation8 + $0x78] sm:$0xff]  ;;  %v151_v1 = vld [vmem:[#allocation8 + $0x70] sm:$0xff]  ;;  %v124_v34 = vlaneseq  ;;  %v556_v57 = vmov 1.0   ;;  %s557_s29 = smov [#allocation14]  }
  0x1c   :  { %v191_v2 = vld [vmem:[#allocation9 + $0x78] sm:$0xff]  ;;  %153 = vmatpush.msra.mxu0 %v152_v0  ;;  %v190_v3 = vld [vmem:[#allocation9 + $0x70] sm:$0xff]  ;;  %v150_v4 = vld [vmem:[#allocation8 + $0x68] sm:$0xff]  ;;  %s338_s30 = sshll.u32 %s557_s29, 4  ;;  %s340_s10 = sshll.u32 %s629_s7, 4  ;;  %s339_s30 = int_to_ptr.vmem [resolvable:$true] %s338_s30  ;;  %s341_s10 = int_to_ptr.hbm [resolvable:$true] %s340_s10 }
  0x1d   :  { %192 = vmatpush.msra.mxu1 %v191_v2  ;;  %v189_v5 = vld [vmem:[#allocation9 + $0x68] sm:$0xff]  ;;  %v149_v6 = vld [vmem:[#allocation8 + $0x60] sm:$0xff]  ;;  %v148_v8 = vld [vmem:[#allocation8 + $0x58] sm:$0xff]  ;;  %v125_v45 = vshrl.u32 %v124_v34, 7 }
  0x1e   :  { %154 = vmatpush.msra.mxu0 %v151_v1  ;;  %v188_v7 = vld [vmem:[#allocation9 + $0x60] sm:$0xff]  ;;  %v187_v9 = vld [vmem:[#allocation9 + $0x58] sm:$0xff]  ;;  %v147_v10 = vld [vmem:[#allocation8 + $0x50] sm:$0xff] }
  0x1f   :  { %193 = vmatpush.msra.mxu1 %v190_v3  ;;  %v186_v11 = vld [vmem:[#allocation9 + $0x50] sm:$0xff]  ;;  %v146_v12 = vld [vmem:[#allocation8 + $0x48] sm:$0xff]  ;;  %v145_v14 = vld [vmem:[#allocation8 + $0x40] sm:$0xff] }
  0x20   :  { %155 = vmatpush.msra.mxu0 %v150_v4  ;;  %v185_v13 = vld [vmem:[#allocation9 + $0x48] sm:$0xff]  ;;  %v184_v15 = vld [vmem:[#allocation9 + $0x40] sm:$0xff]  ;;  %v234_v18 = vld [vmem:[#allocation12 + $0x70] sm:$0xff] }
  0x21   :  { %194 = vmatpush.msra.mxu1 %v189_v5  ;;  %v235_v16 = vld [vmem:[#allocation12 + $0x78] sm:$0xff]  ;;  %v250_v19 = vld [vmem:[#allocation12 + $0xf0] sm:$0xff]  ;;  %v233_v22 = vld [vmem:[#allocation12 + $0x68] sm:$0xff] }
  0x22   :  { %156 = vmatpush.msra.mxu0 %v149_v6  ;;  %v251_v17 = vld [vmem:[#allocation12 + $0xf8] sm:$0xff]  ;;  %v144_v20 = vld [vmem:[#allocation8 + $0x38] sm:$0xff]  ;;  %272 = vmatpush.msra.mxu2 %v235_v16  ;;  %v249_v23 = vld [vmem:[#allocation12 + $0xe8] sm:$0xff] }
  0x23   :  { %195 = vmatpush.msra.mxu1 %v188_v7  ;;  %v183_v21 = vld [vmem:[#allocation9 + $0x38] sm:$0xff]  ;;  %292 = vmatpush.msra.mxu3 %v251_v17  ;;  %v143_v24 = vld [vmem:[#allocation8 + $0x30] sm:$0xff]  ;;  %v232_v26 = vld [vmem:[#allocation12 + $0x60] sm:$0xff] }
  0x24   :  { %157 = vmatpush.msra.mxu0 %v148_v8  ;;  %v182_v25 = vld [vmem:[#allocation9 + $0x30] sm:$0xff]  ;;  %273 = vmatpush.msra.mxu2 %v234_v18  ;;  %v248_v27 = vld [vmem:[#allocation12 + $0xe0] sm:$0xff]  ;;  %v231_v30 = vld [vmem:[#allocation12 + $0x58] sm:$0xff] }
  0x25   :  { %196 = vmatpush.msra.mxu1 %v187_v9  ;;  %293 = vmatpush.msra.mxu3 %v250_v19  ;;  %v142_v28 = vld [vmem:[#allocation8 + $0x28] sm:$0xff]  ;;  %v247_v31 = vld [vmem:[#allocation12 + $0xd8] sm:$0xff]  ;;  %v230_v35 = vld [vmem:[#allocation12 + $0x50] sm:$0xff] }
  0x26   :  { %158 = vmatpush.msra.mxu0 %v147_v10  ;;  %v181_v29 = vld [vmem:[#allocation9 + $0x28] sm:$0xff]  ;;  %274 = vmatpush.msra.mxu2 %v233_v22  ;;  %v141_v32 = vld [vmem:[#allocation8 + $0x20] sm:$0xff]  ;;  %v246_v36 = vld [vmem:[#allocation12 + $0xd0] sm:$0xff] }
  0x27   :  { %197 = vmatpush.msra.mxu1 %v186_v11  ;;  %294 = vmatpush.msra.mxu3 %v249_v23  ;;  %v180_v33 = vld [vmem:[#allocation9 + $0x20] sm:$0xff]  ;;  %v140_v37 = vld [vmem:[#allocation8 + $0x18] sm:$0xff]  ;;  %v139_v39 = vld [vmem:[#allocation8 + $0x10] sm:$0xff] }
  0x28   :  { %159 = vmatpush.msra.mxu0 %v146_v12  ;;  %275 = vmatpush.msra.mxu2 %v232_v26  ;;  %v179_v38 = vld [vmem:[#allocation9 + $0x18] sm:$0xff]  ;;  %v229_v40 = vld [vmem:[#allocation12 + $0x48] sm:$0xff]  ;;  %v228_v46 = vld [vmem:[#allocation12 + $0x40] sm:$0xff] }
  0x29   :  { %198 = vmatpush.msra.mxu1 %v185_v13  ;;  %295 = vmatpush.msra.mxu3 %v248_v27  ;;  %v245_v41 = vld [vmem:[#allocation12 + $0xc8] sm:$0xff]  ;;  %v367_v43 = vld [vmem:[#allocation3] ss:$0 sm:$0xff]  ;;  %v368_v44 = vld [vmem:[#allocation6] ss:$0 sm:$0xff] }
  0x2a   :  { %160 = vmatpush.msra.mxu0 %v145_v14  ;;  %276 = vmatpush.msra.mxu2 %v231_v30  ;;  %v178_v42 = vld [vmem:[#allocation9 + $0x10] sm:$0xff]  ;;  %v244_v47 = vld [vmem:[#allocation12 + $0xc0] sm:$0xff]  ;;  %v227_v50 = vld [vmem:[#allocation12 + $0x38] sm:$0xff]  ;;  %vm128_vm0 = vcmp.eq.s32.totalorder %v367_v43, %v125_v45  ;;  %vm133_vm1 = vcmp.eq.s32.totalorder %v368_v44, %v125_v45 }
  0x2b   :  { %199 = vmatpush.msra.mxu1 %v184_v15  ;;  %296 = vmatpush.msra.mxu3 %v247_v31  ;;  %v138_v48 = vld [vmem:[#allocation8 + $0x8] sm:$0xff]  ;;  %v243_v51 = vld [vmem:[#allocation12 + $0xb8] sm:$0xff]  ;;  %v226_v55 = vld [vmem:[#allocation12 + $0x30] sm:$0xff] }
  0x2c   :  { %161 = vmatpush.msra.mxu0 %v144_v20  ;;  %277 = vmatpush.msra.mxu2 %v230_v35  ;;  %v177_v49 = vld [vmem:[#allocation9 + $0x8] sm:$0xff]  ;;  %v137_v52 = vld [vmem:[#allocation8] sm:$0xff]  ;;  %v242_v56 = vld [vmem:[#allocation12 + $0xb0] sm:$0xff] }
  0x2d   :  { %200 = vmatpush.msra.mxu1 %v183_v21  ;;  %297 = vmatpush.msra.mxu3 %v246_v36  ;;  %v176_v53 = vld [vmem:[#allocation9] sm:$0xff]  ;;  %v266_v58 = vld [vmem:[#allocation12 + $0x170] sm:$0xff]  ;;  %v225_v59 = vld [vmem:[#allocation12 + $0x28] sm:$0xff] }
  0x2e   :  { %162 = vmatpush.msra.mxu0 %v143_v24  ;;  %278 = vmatpush.msra.mxu2 %v229_v40  ;;  %v267_v54 = vld [vmem:[#allocation12 + $0x178] sm:$0xff]  ;;  %v241_v60 = vld [vmem:[#allocation12 + $0xa8] sm:$0xff]  ;;  %v224_v62 = vld [vmem:[#allocation12 + $0x20] sm:$0xff] }
  0x2f   :  { %201 = vmatpush.msra.mxu1 %v182_v25  ;;  %298 = vmatpush.msra.mxu3 %v245_v41  ;;  %v265_v61 = vld [vmem:[#allocation12 + $0x168] sm:$0xff]  ;;  %v240_v63 = vld [vmem:[#allocation12 + $0xa0] sm:$0xff]  ;;  %v223_v1 = vld [vmem:[#allocation12 + $0x18] sm:$0xff] }
  0x30   :  { %163 = vmatpush.msra.mxu0 %v142_v28  ;;  %279 = vmatpush.msra.mxu2 %v228_v46  ;;  %v264_v0 = vld [vmem:[#allocation12 + $0x160] sm:$0xff]  ;;  %v239_v2 = vld [vmem:[#allocation12 + $0x98] sm:$0xff]  ;;  %v222_v4 = vld [vmem:[#allocation12 + $0x10] sm:$0xff] }
  0x31   :  { %202 = vmatpush.msra.mxu1 %v181_v29  ;;  %299 = vmatpush.msra.mxu3 %v244_v47  ;;  %v263_v3 = vld [vmem:[#allocation12 + $0x158] sm:$0xff]  ;;  %v238_v5 = vld [vmem:[#allocation12 + $0x90] sm:$0xff]  ;;  %v221_v7 = vld [vmem:[#allocation12 + $0x8] sm:$0xff] }
  0x32   :  { %164 = vmatpush.msra.mxu0 %v141_v32  ;;  %280 = vmatpush.msra.mxu2 %v227_v50  ;;  %v262_v6 = vld [vmem:[#allocation12 + $0x150] sm:$0xff]  ;;  %v261_v8 = vld [vmem:[#allocation12 + $0x148] sm:$0xff]  ;;  %v260_v9 = vld [vmem:[#allocation12 + $0x140] sm:$0xff] }
  0x33   :  { %203 = vmatpush.msra.mxu1 %v180_v33  ;;  %300 = vmatpush.msra.mxu3 %v243_v51  ;;  %v259_v10 = vld [vmem:[#allocation12 + $0x138] sm:$0xff]  ;;  %v258_v11 = vld [vmem:[#allocation12 + $0x130] sm:$0xff]  ;;  %v220_v12 = vld [vmem:[#allocation12] sm:$0xff] }
  0x34   :  { %165 = vmatpush.msra.mxu0 %v140_v37  ;;  %281 = vmatpush.msra.mxu2 %v226_v55  ;;  %v237_v13 = vld [vmem:[#allocation12 + $0x88] sm:$0xff]  ;;  %v236_v15 = vld [vmem:[#allocation12 + $0x80] sm:$0xff]  ;;  %v255_v17 = vld [vmem:[#allocation12 + $0x118] sm:$0xff] }
  0x35   :  { %204 = vmatpush.msra.mxu1 %v179_v38  ;;  %301 = vmatpush.msra.mxu3 %v242_v56  ;;  %v257_v14 = vld [vmem:[#allocation12 + $0x128] sm:$0xff]  ;;  %v256_v16 = vld [vmem:[#allocation12 + $0x120] sm:$0xff]  ;;  %v254_v18 = vld [vmem:[#allocation12 + $0x110] sm:$0xff] }
  0x36   :  { %166 = vmatpush.msra.mxu0 %v139_v39  ;;  %282 = vmatpush.msra.mxu2 %v225_v59  ;;  %v253_v19 = vld [vmem:[#allocation12 + $0x108] sm:$0xff]  ;;  %v252_v20 = vld [vmem:[#allocation12 + $0x100] sm:$0xff]  ;;  %v122_v21 = vld [vmem:[#allocation11] sm:$0xff] }
  0x37   :  { %205 = vmatpush.msra.mxu1 %v178_v42  ;;  %302 = vmatpush.msra.mxu3 %v241_v60  ;;  %v369_v24 = vld [vmem:[%s628_s6] ss:$0 sm:$0xff] }
  0x38   :  { %167 = vmatpush.msra.mxu0 %v138_v48  ;;  %283 = vmatpush.msra.mxu2 %v224_v62 }
  0x39   :  { %206 = vmatpush.msra.mxu1 %v177_v49  ;;  %303 = vmatpush.msra.mxu3 %v240_v63 }
  0x3a   :  { %168 = vmatpush.msra.mxu0 %v137_v52  ;;  %284 = vmatpush.msra.mxu2 %v223_v1 }
  0x3b   :  { %207 = vmatpush.msra.mxu1 %v176_v53  ;;  %355 = vmatmul.msk.f32.vlgmr.msra.gmra.mxu0 %vm128_vm0, %v556_v57 }
  0x3c   :  { %356 = vmatmul.msk.f32.vlgmr.msra.gmra.mxu1 %vm133_vm1, %v556_v57  ;;  %312 = vmatpush.msrb.mxu0 %v267_v54 }
  0x3d   :  { %304 = vmatpush.msra.mxu3 %v239_v2  ;;  %285 = vmatpush.msra.mxu2 %v222_v4 }
  0x3e   :  { %313 = vmatpush.msrb.mxu0 %v266_v58 }
  0x3f   :  { %305 = vmatpush.msra.mxu3 %v238_v5  ;;  %286 = vmatpush.msra.mxu2 %v221_v7 }
  0x40   :  { %314 = vmatpush.msrb.mxu0 %v265_v61 }
  0x41   :  { %287 = vmatpush.msra.mxu2 %v220_v12  ;;  %306 = vmatpush.msra.mxu3 %v237_v13 }
  0x42   :  { %315 = vmatpush.msrb.mxu0 %v264_v0 }
  0x43   :  { %307 = vmatpush.msra.mxu3 %v236_v15 }
  0x44   :  { %316 = vmatpush.msrb.mxu0 %v263_v3 }
  0x46   :  { %317 = vmatpush.msrb.mxu0 %v262_v6 }
  0x48   :  { %318 = vmatpush.msrb.mxu0 %v261_v8 }
  0x4a   :  { %319 = vmatpush.msrb.mxu0 %v260_v9 }
  0x4c   :  { %320 = vmatpush.msrb.mxu0 %v259_v10 }
  0x4e   :  { %321 = vmatpush.msrb.mxu0 %v258_v11 }
  0x50   :  { %322 = vmatpush.msrb.mxu0 %v257_v14 }
  0x52   :  { %323 = vmatpush.msrb.mxu0 %v256_v16 }
  0x54   :  { %324 = vmatpush.msrb.mxu0 %v255_v17 }
  0x56   :  { %325 = vmatpush.msrb.mxu0 %v254_v18 }
  0x58   :  { %326 = vmatpush.msrb.mxu0 %v253_v19 }
  0x5a   :  { %327 = vmatpush.msrb.mxu0 %v252_v20 }
  0x5b   :  { %328 = vmatmul.f32.vlgmr.msrb.gmra.mxu0 %v122_v21 }
  0xb8   :  { %v170_v22 = vpop.f32.mrf.mxu0 }
  0xb9   :  { %v209_v23 = vpop.f32.mrf.mxu1  ;;  %288 = vmatmul.f32.vlgmr.msra.gmra.mxu2 %v170_v22 }
  0xba   :  { %308 = vmatmul.f32.vlgmr.msra.gmra.mxu3 %v209_v23 }
  0xd8   :  { %v329_v28 = vpop.f32.mrf.mxu0 }
 0x13c   :  { %v289_v25 = vpop.f32.mrf.mxu2 }
 0x13d   :  { %v309_v26 = vpop.f32.mrf.mxu3  ;;  %v290_v27 = vadd.f32 %v369_v24, %v289_v25 }
 0x13f   :  { %v310_v29 = vadd.f32 %v309_v26, %v290_v27 }
 0x141   :  { %v330_v30 = vadd.f32 %v329_v28, %v310_v29 }
 0x143   :  { %332 = vst [vmem:[#allocation14] sm:$0xff] %v330_v30 }
 0x144   :  { %343 = dma.vmem_to_hbm [thread:$0]  %s339_s30, 128, %s341_s10, [#allocation5]  }
 0x145   :  { %546 = dma.done.wait [#allocation5], 128  }
 0x146   :  { %547 = vsyncadd [#allocation5], 4294967168 }
 0x147   :  { %348 = vsyncpa [#allocation4], 1 }
 0x148   :  { %349 = vsyncpa [#allocation7], 1 }
 0x149   :  { %350 = vsyncpa [#allocation10], 1 }
 0x14a   :  { %351 = vsyncpa [#allocation13], 1 }
 0x14b   :  { %352 = vsyncpa [#allocation5], 1 }

</bundles_post_ra>
